<compile_context>
chip_gen: v7x
topology: tpu7x:2x2x1
jax: 0.10.0
libtpu: 0.0.40
codegen_flags: <defaults>
</compile_context>

<pallas_src>
import functools

import jax
import jax.numpy as jnp
from jax import lax
from jax.experimental import pallas as pl
from jax.experimental.pallas import tpu as pltpu


def _mlp_kernel(x_ref, w1_ref, b1_ref, w2_ref, b2_ref, w3_ref, b3_ref, o_ref):
    # x tile arrives in native (tm, n_in) layout.  Contract both operands over
    # their LAST axis so the result is already transposed (batch on lanes):
    #   (15, n_in) . (tm, n_in) -> (15, tm)
    h1 = lax.dot_general(
        w1_ref[...], x_ref[...],
        dimension_numbers=(((1,), (1,)), ((), ())),
        preferred_element_type=jnp.float32,
    ) + b1_ref[...]
    h1 = jax.nn.sigmoid(h1)
    # Layer 2: (8, 15) @ (15, tm) + (8, 1) -> (8, tm)
    h2 = jnp.dot(w2_ref[...], h1, preferred_element_type=jnp.float32) + b2_ref[...]
    h2 = jax.nn.sigmoid(h2)
    # Layer 3: (1, 8) @ (8, tm) + (1, 1) -> (1, tm)   (lane-dense output row)
    h3 = jnp.dot(w3_ref[...], h2, preferred_element_type=jnp.float32) + b3_ref[...]
    o_ref[...] = jax.nn.sigmoid(h3).astype(o_ref.dtype)


def _round_up(n, m):
    return ((n + m - 1) // m) * m


def _pick_tm(B, max_tm=4096):
    """Batch tile: big enough to amortize the ~0.35 us per-step overhead,
    a single fat step for small batches, >= 2 steps on dual-TC chips (v7x)."""
    min_steps = 1
    try:
        if "v7" in jax.devices()[0].device_kind.lower():
            min_steps = 2
    except Exception:  # pragma: no cover - defensive; tm heuristic only
        pass
    B_r = _round_up(B, 128)
    tm = min(max_tm, B_r)
    if min_steps > 1 and B_r >= min_steps * 128:
        tm = min(tm, _round_up(pl.cdiv(B_r, min_steps), 128))
    return tm


@functools.partial(jax.jit, static_argnames=("tm",))
def red_forward(x, w1, b1, w2, b2, w3, b3, *, tm=None):
    """x: (B, n_entradas) f32.  Returns (B, 1) f32 == sigmoid(MLP(x))."""
    B, n_in = x.shape
    if tm is None:
        tm = _pick_tm(B)
    n_tiles = pl.cdiv(B, tm)                      # static under jit

    def full(shape):
        return pl.BlockSpec(shape, lambda i: (0, 0))

    param_bytes = 4 * sum(a.size for a in (w1, b1, w2, b2, w3, b3))
    cost = pl.CostEstimate(
        flops=2 * B * (n_in * 15 + 15 * 8 + 8 * 1),
        transcendentals=B * (15 + 8 + 1),
        bytes_accessed=4 * (x.size + B) + param_bytes,
    )

    outT = pl.pallas_call(
        _mlp_kernel,
        out_shape=jax.ShapeDtypeStruct((1, B), jnp.float32),
        grid=(n_tiles,),
        in_specs=[
            pl.BlockSpec((tm, n_in), lambda i: (i, 0)),   # x: native layout, batch-tiled
            full(w1.shape), full(b1.shape),               # tiny params, VMEM-resident
            full(w2.shape), full(b2.shape),
            full(w3.shape), full(b3.shape),
        ],
        out_specs=pl.BlockSpec((1, tm), lambda i: (0, i)),  # lane-dense output row
        compiler_params=pltpu.CompilerParams(
            dimension_semantics=("parallel",)),
        cost_estimate=cost,
    )(x, w1, b1, w2, b2, w3, b3)

    # (1, B) -> (B, 1): pure reshape, no data movement.
    return jnp.reshape(outT, (B, 1))


def init_params(key, n_entradas):
    """Deterministic init mimicking PyTorch nn.Linear default U[-1/sqrt(fan_in), +].

    Weights are (out_features, in_features); biases are (out_features, 1)
    columns so they broadcast over the lane (batch) axis inside the kernel.
    """
    dims = [(n_entradas, 15), (15, 8), (8, 1)]
    params = []
    for fan_in, fan_out in dims:
        kw, kb, key = jax.random.split(key, 3)
        bound = 1.0 / jnp.sqrt(jnp.float32(fan_in))
        w = jax.random.uniform(kw, (fan_out, fan_in), jnp.float32, -bound, bound)
        b = jax.random.uniform(kb, (fan_out, 1), jnp.float32, -bound, bound)
        params += [w, b]
    return params


def red_reference(x, w1, b1, w2, b2, w3, b3):
    h1 = jax.nn.sigmoid(x @ w1.T + b1.T)
    h2 = jax.nn.sigmoid(h1 @ w2.T + b2.T)
    return jax.nn.sigmoid(h2 @ w3.T + b3.T)


if __name__ == "__main__":
    key = jax.random.PRNGKey(0)
    n_entradas = 32        # number of input features (x_train.shape[1])

    kx1, kx2, kp = jax.random.split(key, 3)
    params = init_params(kp, n_entradas)

    # Small ragged batch: exercises the masked partial last block (no padding).
    x_small = jax.random.normal(kx1, (300, n_entradas), jnp.float32)
    out_small = jax.block_until_ready(red_forward(x_small, *params))
    ref_small = red_reference(x_small, *params)
    assert out_small.shape == (300, 1), out_small.shape
    assert jnp.allclose(out_small, ref_small, atol=1e-5, rtol=1e-5), "small-batch mismatch"

    # Larger batch: exercises the multi-step grid with the big default tile.
    x_big = jax.random.normal(kx2, (9000, n_entradas), jnp.float32)
    out_big = jax.block_until_ready(red_forward(x_big, *params))
    ref_big = red_reference(x_big, *params)
    assert out_big.shape == (9000, 1), out_big.shape
    assert jnp.allclose(out_big, ref_big, atol=1e-5, rtol=1e-5), "big-batch mismatch"

    print("KERNEL_OK")
</pallas_src>

<mosaic_0001>
module attributes {stable_mosaic.version = 11 : i64} {
  func.func @_mlp_kernel(%arg0: i32, %arg1: memref<384x32xf32, #tpu.memory_space<vmem>>, %arg2: memref<15x32xf32, #tpu.memory_space<vmem>>, %arg3: memref<15x1xf32, #tpu.memory_space<vmem>>, %arg4: memref<8x15xf32, #tpu.memory_space<vmem>>, %arg5: memref<8x1xf32, #tpu.memory_space<vmem>>, %arg6: memref<1x8xf32, #tpu.memory_space<vmem>>, %arg7: memref<1x1xf32, #tpu.memory_space<vmem>>, %arg8: memref<1x384xf32, #tpu.memory_space<vmem>>) attributes {dimension_semantics = [#tpu.dimension_semantics<parallel>], iteration_bounds = array<i64: 1>, scalar_prefetch = 0 : i64, scratch_operands = 0 : i64, tpu.core_type = #tpu.core_type<tc>, window_params = [{transform_indices = @transform_0, window_bounds = array<i64: 384, 32>}, {pipeline_mode = #tpu.pipeline_mode<synchronous>, transform_indices = @transform_1, window_bounds = array<i64: 15, 32>}, {pipeline_mode = #tpu.pipeline_mode<synchronous>, transform_indices = @transform_2, window_bounds = array<i64: 15, 1>}, {pipeline_mode = #tpu.pipeline_mode<synchronous>, transform_indices = @transform_3, window_bounds = array<i64: 8, 15>}, {pipeline_mode = #tpu.pipeline_mode<synchronous>, transform_indices = @transform_4, window_bounds = array<i64: 8, 1>}, {pipeline_mode = #tpu.pipeline_mode<synchronous>, transform_indices = @transform_5, window_bounds = array<i64: 1, 8>}, {pipeline_mode = #tpu.pipeline_mode<synchronous>, transform_indices = @transform_6, window_bounds = array<i64: 1, 1>}, {transform_indices = @transform_7, window_bounds = array<i64: 1, 384>}]} {
    %c0 = arith.constant 0 : index
    %c0_0 = arith.constant 0 : index
    %0 = vector.load %arg2[%c0, %c0_0] : memref<15x32xf32, #tpu.memory_space<vmem>>, vector<15x32xf32>
    %c0_1 = arith.constant 0 : index
    %c0_2 = arith.constant 0 : index
    %1 = vector.load %arg1[%c0_1, %c0_2] : memref<384x32xf32, #tpu.memory_space<vmem>>, vector<384x32xf32>
    %cst = arith.constant dense<0.000000e+00> : vector<15x384xf32>
    %2 = tpu.matmul %0, %1, %cst {dimension_numbers = #tpu.dot_dimension_numbers<[1], [1], [0], [0], [0, 0, 1, 0], [], []>} : vector<15x32xf32>, vector<384x32xf32>, vector<15x384xf32> -> vector<15x384xf32>
    %c0_3 = arith.constant 0 : index
    %c0_4 = arith.constant 0 : index
    %3 = vector.load %arg3[%c0_3, %c0_4] : memref<15x1xf32, #tpu.memory_space<vmem>>, vector<15x1xf32>
    %4 = vector.broadcast %3 : vector<15x1xf32> to vector<15x384xf32>
    %5 = arith.addf %2, %4 : vector<15x384xf32>
    %6 = arith.negf %5 : vector<15x384xf32>
    %7 = math.exp %6 : vector<15x384xf32>
    %cst_5 = arith.constant 1.000000e+00 : f32
    %8 = vector.broadcast %cst_5 : f32 to vector<15x384xf32>
    %9 = arith.addf %8, %7 : vector<15x384xf32>
    %10 = arith.divf %8, %9 : vector<15x384xf32>
    %c0_6 = arith.constant 0 : index
    %c0_7 = arith.constant 0 : index
    %11 = vector.load %arg4[%c0_6, %c0_7] : memref<8x15xf32, #tpu.memory_space<vmem>>, vector<8x15xf32>
    %cst_8 = arith.constant dense<0.000000e+00> : vector<8x384xf32>
    %12 = tpu.matmul %11, %10, %cst_8 {dimension_numbers = #tpu.dot_dimension_numbers<[1], [0], [0], [1], [0, 0, 1, 1], [], []>} : vector<8x15xf32>, vector<15x384xf32>, vector<8x384xf32> -> vector<8x384xf32>
    %c0_9 = arith.constant 0 : index
    %c0_10 = arith.constant 0 : index
    %13 = vector.load %arg5[%c0_9, %c0_10] : memref<8x1xf32, #tpu.memory_space<vmem>>, vector<8x1xf32>
    %14 = vector.broadcast %13 : vector<8x1xf32> to vector<8x384xf32>
    %15 = arith.addf %12, %14 : vector<8x384xf32>
    %16 = arith.negf %15 : vector<8x384xf32>
    %17 = math.exp %16 : vector<8x384xf32>
    %cst_11 = arith.constant 1.000000e+00 : f32
    %18 = vector.broadcast %cst_11 : f32 to vector<8x384xf32>
    %19 = arith.addf %18, %17 : vector<8x384xf32>
    %20 = arith.divf %18, %19 : vector<8x384xf32>
    %c0_12 = arith.constant 0 : index
    %c0_13 = arith.constant 0 : index
    %21 = vector.load %arg6[%c0_12, %c0_13] : memref<1x8xf32, #tpu.memory_space<vmem>>, vector<1x8xf32>
    %cst_14 = arith.constant dense<0.000000e+00> : vector<1x384xf32>
    %22 = tpu.matmul %21, %20, %cst_14 {dimension_numbers = #tpu.dot_dimension_numbers<[1], [0], [0], [1], [0, 0, 1, 1], [], []>} : vector<1x8xf32>, vector<8x384xf32>, vector<1x384xf32> -> vector<1x384xf32>
    %c0_15 = arith.constant 0 : index
    %c0_16 = arith.constant 0 : index
    %23 = vector.load %arg7[%c0_15, %c0_16] : memref<1x1xf32, #tpu.memory_space<vmem>>, vector<1x1xf32>
    %24 = vector.broadcast %23 : vector<1x1xf32> to vector<1x384xf32>
    %25 = arith.addf %22, %24 : vector<1x384xf32>
    %26 = arith.negf %25 : vector<1x384xf32>
    %27 = math.exp %26 : vector<1x384xf32>
    %cst_17 = arith.constant 1.000000e+00 : f32
    %28 = vector.broadcast %cst_17 : f32 to vector<1x384xf32>
    %29 = arith.addf %28, %27 : vector<1x384xf32>
    %30 = arith.divf %28, %29 : vector<1x384xf32>
    %c0_18 = arith.constant 0 : index
    %c0_19 = arith.constant 0 : index
    %31 = vector.load %arg8[%c0_18, %c0_19] : memref<1x384xf32, #tpu.memory_space<vmem>>, vector<1x384xf32>
    tpu.vector_store %arg8[%c0_18, %c0_19], %30 {strides = array<i32>} : memref<1x384xf32, #tpu.memory_space<vmem>>, vector<1x384xf32>,
    return
  }
  func.func @transform_0(%arg0: i32) -> (i32, i32) {
    %c0_i32 = arith.constant 0 : i32
    %c0_i32_0 = arith.constant 0 : i32
    return %arg0, %c0_i32 : i32, i32
  }
  func.func @transform_1(%arg0: i32) -> (i32, i32) {
    %c0_i32 = arith.constant 0 : i32
    %c0_i32_0 = arith.constant 0 : i32
    %c0_i32_1 = arith.constant 0 : i32
    return %c0_i32, %c0_i32_0 : i32, i32
  }
  func.func @transform_2(%arg0: i32) -> (i32, i32) {
    %c0_i32 = arith.constant 0 : i32
    %c0_i32_0 = arith.constant 0 : i32
    %c0_i32_1 = arith.constant 0 : i32
    return %c0_i32, %c0_i32_0 : i32, i32
  }
  func.func @transform_3(%arg0: i32) -> (i32, i32) {
    %c0_i32 = arith.constant 0 : i32
    %c0_i32_0 = arith.constant 0 : i32
    %c0_i32_1 = arith.constant 0 : i32
    return %c0_i32, %c0_i32_0 : i32, i32
  }
  func.func @transform_4(%arg0: i32) -> (i32, i32) {
    %c0_i32 = arith.constant 0 : i32
    %c0_i32_0 = arith.constant 0 : i32
    %c0_i32_1 = arith.constant 0 : i32
    return %c0_i32, %c0_i32_0 : i32, i32
  }
  func.func @transform_5(%arg0: i32) -> (i32, i32) {
    %c0_i32 = arith.constant 0 : i32
    %c0_i32_0 = arith.constant 0 : i32
    %c0_i32_1 = arith.constant 0 : i32
    return %c0_i32, %c0_i32_0 : i32, i32
  }
  func.func @transform_6(%arg0: i32) -> (i32, i32) {
    %c0_i32 = arith.constant 0 : i32
    %c0_i32_0 = arith.constant 0 : i32
    %c0_i32_1 = arith.constant 0 : i32
    return %c0_i32, %c0_i32_0 : i32, i32
  }
  func.func @transform_7(%arg0: i32) -> (i32, i32) {
    %c0_i32 = arith.constant 0 : i32
    %c0_i32_0 = arith.constant 0 : i32
    return %c0_i32, %arg0 : i32, i32
  }
}

</mosaic_0001>

<bundles_post_ra>
// kernel: red_forward.1
= control target key start
LH: loop header
LB: loop body
LE: loop exit
PB: predicated region body
PF: predicated region fallthrough
CT: control target
= control target key end

     0   :  { %s1509_s0 = inlined_call_operand.vmem [shape: f32[300,32], index: 0, kind: input, shape index: {}]   ;;  %s1510_s1 = inlined_call_operand.vmem [shape: f32[15,32], index: 1, kind: input, shape index: {}]   ;;  %s1511_s2 = inlined_call_operand.vmem [shape: f32[15,1], index: 2, kind: input, shape index: {}]   ;;  %s1512_s3 = inlined_call_operand.vmem [shape: f32[8,15], index: 3, kind: input, shape index: {}]   ;;  %s1513_s4 = inlined_call_operand.vmem [shape: f32[8,1], index: 4, kind: input, shape index: {}]   ;;  %s1514_s5 = inlined_call_operand.vmem [shape: f32[1,8], index: 5, kind: input, shape index: {}]   ;;  %s1515_s6 = inlined_call_operand.<no memory space> [shape: f32[1,1], index: 6, kind: input, shape index: {}]   ;;  %s1516_s7 = inlined_call_operand.hbm [shape: f32[1,300], index: 7, kind: output, shape index: {}]  }
   0x1   :  { %v12_v0 = vstv %s1515_s6 }
   0x2   :  { %13 = vst [vmem:[#allocation2] sm:$0x1] %v12_v0 }
   0x3   :  { %v47_v1 = vld [vmem:[%s1509_s0 + $0x80] sm:$0xff]  ;;  %v48_v2 = vld [vmem:[%s1509_s0 + $0x88] sm:$0xff]  ;;  %vm91_vm0 = vcmask 261120   ;;  %v1194_v8 = vmov 0   ;;  %v49_v11 = vld [vmem:[%s1509_s0 + $0x90] sm:$0xff] }
   0x4   :  { %v63_v3 = vld [vmem:[%s1509_s0 + $0x100] sm:$0xff]  ;;  %v1007_v4 = vpack.c.bf16 %v48_v2, %v47_v1  ;;  %vm1255_vm1 = vmpackc.low %vm91_vm0, %vm91_vm0  ;;  %v64_v6 = vld [vmem:[%s1509_s0 + $0x108] sm:$0xff]  ;;  %1120 = vset.pattern.permute.xlu0 %v1194_v8  ;;  %1121 = vset.pattern.permute.xlu1 %v1194_v8 }
   0x5   :  { %v31_v7 = vld [vmem:[%s1509_s0] sm:$0xff]  ;;  %v1055_v9 = vpack.c.bf16 %v64_v6, %v63_v3  ;;  %v32_v10 = vld [vmem:[%s1509_s0 + $0x8] sm:$0xff]  ;;  %v50_v12 = vld [vmem:[%s1509_s0 + $0x98] sm:$0xff] }
   0x6   :  { %1009 = vmatprep.subr.msk.bf16.mxu0 %vm1255_vm1, %v1007_v4  ;;  %v1010_v13 = vpack.c.bf16 %v32_v10, %v31_v7  ;;  %v1013_v14 = vpack.c.bf16 %v50_v12, %v49_v11  ;;  %v65_v15 = vld [vmem:[%s1509_s0 + $0x110] sm:$0xff]  ;;  %v66_v16 = vld [vmem:[%s1509_s0 + $0x118] sm:$0xff]  ;;  %v51_v20 = vld [vmem:[%s1509_s0 + $0xa0] sm:$0xff] }
   0x7   :  { %1057 = vmatprep.subr.msk.bf16.mxu1 %vm1255_vm1, %v1055_v9  ;;  %v1061_v17 = vpack.c.bf16 %v66_v16, %v65_v15  ;;  %v33_v18 = vld [vmem:[%s1509_s0 + $0x10] sm:$0xff]  ;;  %v34_v19 = vld [vmem:[%s1509_s0 + $0x18] sm:$0xff]  ;;  %v52_v21 = vld [vmem:[%s1509_s0 + $0xa8] sm:$0xff] }
   0x8   :  { %1012 = vmatpush3.bf16.xpose.msk.msra.mxu0 %vm1255_vm1, %v1010_v13  ;;  %1060 = vmatpush3.bf16.xpose.msk.msra.mxu1 %vm1255_vm1, %v1055_v9  ;;  %v67_v22 = vld [vmem:[%s1509_s0 + $0x120] sm:$0xff]  ;;  %v68_v23 = vld [vmem:[%s1509_s0 + $0x128] sm:$0xff]  ;;  %v1016_v24 = vpack.c.bf16 %v34_v19, %v33_v18  ;;  %v1019_v25 = vpack.c.bf16 %v52_v21, %v51_v20  ;;  %v53_v29 = vld [vmem:[%s1509_s0 + $0xb0] sm:$0xff] }
   0x9   :  { %1015 = vmatprep.subr.msk.bf16.mxu0 %vm1255_vm1, %v1013_v14  ;;  %1063 = vmatprep.subr.msk.bf16.mxu1 %vm1255_vm1, %v1061_v17  ;;  %v1067_v26 = vpack.c.bf16 %v68_v23, %v67_v22  ;;  %v35_v27 = vld [vmem:[%s1509_s0 + $0x20] sm:$0xff]  ;;  %v36_v28 = vld [vmem:[%s1509_s0 + $0x28] sm:$0xff]  ;;  %v54_v30 = vld [vmem:[%s1509_s0 + $0xb8] sm:$0xff] }
   0xa   :  { %v69_v31 = vld [vmem:[%s1509_s0 + $0x130] sm:$0xff]  ;;  %v70_v32 = vld [vmem:[%s1509_s0 + $0x138] sm:$0xff]  ;;  %v1339_v33 = vld [vmem:[%s1510_s1] sm:$0xff]  ;;  %v1022_v34 = vpack.c.bf16 %v36_v28, %v35_v27 }
   0xb   :  { %933 = vmatprep.mubr.msk.f32.mxu0 %vm91_vm0, %v1339_v33  ;;  %992 = vmatprep.mubr.msk.f32.mxu1 %vm91_vm0, %v1339_v33  ;;  %v79_v35 = vld [vmem:[%s1511_s2] sm:$0xff] }
  0x10   :  { %1018 = vmatpush3.bf16.xpose.msk.msra.mxu0 %vm1255_vm1, %v1016_v24  ;;  %1066 = vmatpush3.bf16.xpose.msk.msra.mxu1 %vm1255_vm1, %v1061_v17 }
  0x11   :  { %1021 = vmatprep.subr.msk.bf16.mxu0 %vm1255_vm1, %v1019_v25  ;;  %1069 = vmatprep.subr.msk.bf16.mxu1 %vm1255_vm1, %v1067_v26 }
  0x12   :  { %14 = vsyncpa [#allocation4], 0  ;;  %v1025_v36 = vpack.c.bf16 %v54_v30, %v53_v29  ;;  %v1073_v37 = vpack.c.bf16 %v70_v32, %v69_v31  ;;  %83 = vperm.xlu0 %1120, %v79_v35   ;;  %v80_v38 = vld [vmem:[%s1511_s2 + $0x8] sm:$0x7f]  ;;  %v37_v39 = vld [vmem:[%s1509_s0 + $0x30] sm:$0xff]  ;;  %v1195_v16 = vmov 0.0|0.0  }
  0x13   :  { %v38_v40 = vld [vmem:[%s1509_s0 + $0x38] sm:$0xff]  ;;  %v55_v41 = vld [vmem:[%s1509_s0 + $0xc0] sm:$0xff]  ;;  %v56_v42 = vld [vmem:[%s1509_s0 + $0xc8] sm:$0xff]  ;;  %vm1196_vm2 = vmmov 0   ;;  %v1197_v17 = vmov 0.0   ;;  %vm441_vm3 = vcmask 1046528  }
  0x14   :  { %v71_v43 = vld [vmem:[%s1509_s0 + $0x140] sm:$0xff]  ;;  %v72_v44 = vld [vmem:[%s1509_s0 + $0x148] sm:$0xff]  ;;  %v1028_v45 = vpack.c.bf16 %v38_v40, %v37_v39  ;;  %v1031_v46 = vpack.c.bf16 %v56_v42, %v55_v41  ;;  %v57_v50 = vld [vmem:[%s1509_s0 + $0xd0] sm:$0xff]  ;;  %vm1198_vm4 = vmmov 1   ;;  %vm437_vm6 = vcmask 121856  }
  0x15   :  { %v1079_v47 = vpack.c.bf16 %v72_v44, %v71_v43  ;;  %v39_v48 = vld [vmem:[%s1509_s0 + $0x40] sm:$0xff]  ;;  %v40_v49 = vld [vmem:[%s1509_s0 + $0x48] sm:$0xff]  ;;  %v58_v51 = vld [vmem:[%s1509_s0 + $0xd8] sm:$0xff]  ;;  %vm621_vm7 = vcmask 64512  }
  0x16   :  { %88 = vperm.xlu0 %1120, %v80_v38   ;;  %v73_v52 = vld [vmem:[%s1509_s0 + $0x150] sm:$0xff]  ;;  %v74_v53 = vld [vmem:[%s1509_s0 + $0x158] sm:$0xff]  ;;  %v1034_v54 = vpack.c.bf16 %v40_v49, %v39_v48  ;;  %v1037_v55 = vpack.c.bf16 %v58_v51, %v57_v50  ;;  %v59_v59 = vld [vmem:[%s1509_s0 + $0xe0] sm:$0xff] }
  0x17   :  { %v1085_v56 = vpack.c.bf16 %v74_v53, %v73_v52  ;;  %v41_v57 = vld [vmem:[%s1509_s0 + $0x50] sm:$0xff]  ;;  %v42_v58 = vld [vmem:[%s1509_s0 + $0x58] sm:$0xff]  ;;  %v60_v60 = vld [vmem:[%s1509_s0 + $0xe8] sm:$0xff] }
  0x18   :  { %1024 = vmatpush3.bf16.xpose.msk.msra.mxu0 %vm1255_vm1, %v1022_v34  ;;  %1072 = vmatpush3.bf16.xpose.msk.msra.mxu1 %vm1255_vm1, %v1067_v26  ;;  %v75_v61 = vld [vmem:[%s1509_s0 + $0x160] sm:$0xff]  ;;  %v76_v62 = vld [vmem:[%s1509_s0 + $0x168] sm:$0xff]  ;;  %v1040_v63 = vpack.c.bf16 %v42_v58, %v41_v57  ;;  %v1043_v0 = vpack.c.bf16 %v60_v60, %v59_v59  ;;  %v61_v4 = vld [vmem:[%s1509_s0 + $0xf0] sm:$0xff] }
  0x19   :  { %1027 = vmatprep.subr.msk.bf16.mxu0 %vm1255_vm1, %v1025_v36  ;;  %1075 = vmatprep.subr.msk.bf16.mxu1 %vm1255_vm1, %v1073_v37  ;;  %v1091_v1 = vpack.c.bf16 %v76_v62, %v75_v61  ;;  %v43_v2 = vld [vmem:[%s1509_s0 + $0x60] sm:$0xff]  ;;  %v44_v3 = vld [vmem:[%s1509_s0 + $0x68] sm:$0xff]  ;;  %v62_v6 = vld [vmem:[%s1509_s0 + $0xf8] sm:$0xff] }
  0x1a   :  { %v77_v7 = vld [vmem:[%s1509_s0 + $0x170] sm:$0xff]  ;;  %v78_v8 = vld [vmem:[%s1509_s0 + $0x178] sm:$0xff]  ;;  %v1046_v9 = vpack.c.bf16 %v44_v3, %v43_v2  ;;  %v1049_v10 = vpack.c.bf16 %v62_v6, %v61_v4  ;;  %v30_v15 = vld [vmem:[%s1510_s1 + $0x8] sm:$0x7f] }
  0x1b   :  { %v1097_v11 = vpack.c.bf16 %v78_v8, %v77_v7  ;;  %v45_v12 = vld [vmem:[%s1509_s0 + $0x70] sm:$0xff]  ;;  %v46_v13 = vld [vmem:[%s1509_s0 + $0x78] sm:$0xff]  ;;  %v431_v5 = vld [vmem:[%s1513_s4] sm:$0xff] }
  0x1c   :  { %v1052_v14 = vpack.c.bf16 %v46_v13, %v45_v12  ;;  %434 = vperm.xlu1 %1121, %v431_v5   ;;  %v611_v18 = vld [vmem:[#allocation2] sm:$0x1]  ;;  %vm1104_vm5 = vmpackc.low %vm441_vm3, %vm1198_vm4 }
  0x1d   :  { %v430_v59 = vld [vmem:[%s1512_s3] sm:$0xff] }
  0x20   :  { %1030 = vmatpush3.bf16.xpose.msk.msra.mxu0 %vm1255_vm1, %v1028_v45  ;;  %1078 = vmatpush3.bf16.xpose.msk.msra.mxu1 %vm1255_vm1, %v1073_v37 }
  0x21   :  { %1033 = vmatprep.subr.msk.bf16.mxu0 %vm1255_vm1, %v1031_v46  ;;  %1081 = vmatprep.subr.msk.bf16.mxu1 %vm1255_vm1, %v1079_v47 }
  0x22   :  { %614 = vperm.xlu1 %1121, %v611_v18   ;;  %v617_v18 = vlaneseq }
  0x24   :  { %vm813_vm8 = vcmp.lt.s32.totalorder %v617_v18, 384 }
  0x28   :  { %1036 = vmatpush3.bf16.xpose.msk.msra.mxu0 %vm1255_vm1, %v1034_v54  ;;  %1084 = vmatpush3.bf16.xpose.msk.msra.mxu1 %vm1255_vm1, %v1079_v47 }
  0x29   :  { %1039 = vmatprep.subr.msk.bf16.mxu0 %vm1255_vm1, %v1037_v55  ;;  %1087 = vmatprep.subr.msk.bf16.mxu1 %vm1255_vm1, %v1085_v56 }
  0x30   :  { %1042 = vmatpush3.bf16.xpose.msk.msra.mxu0 %vm1255_vm1, %v1040_v63  ;;  %1090 = vmatpush3.bf16.xpose.msk.msra.mxu1 %vm1255_vm1, %v1085_v56 }
  0x31   :  { %1045 = vmatprep.subr.msk.bf16.mxu0 %vm1255_vm1, %v1043_v0  ;;  %1093 = vmatprep.subr.msk.bf16.mxu1 %vm1255_vm1, %v1091_v1 }
  0x38   :  { %1048 = vmatpush3.bf16.xpose.msk.msra.mxu0 %vm1255_vm1, %v1046_v9  ;;  %1096 = vmatpush3.bf16.xpose.msk.msra.mxu1 %vm1255_vm1, %v1091_v1 }
  0x39   :  { %1051 = vmatprep.subr.msk.bf16.mxu0 %vm1255_vm1, %v1049_v10  ;;  %1099 = vmatprep.subr.msk.bf16.mxu1 %vm1255_vm1, %v1097_v11 }
  0x40   :  { %1054 = vmatpush3.bf16.xpose.msk.msra.mxu0 %vm1255_vm1, %v1052_v14  ;;  %1102 = vmatpush3.bf16.xpose.msk.msra.mxu1 %vm1255_vm1, %v1097_v11 }
  0x41   :  { %1109 = vmatprep.subr.bf16.mxu0 %v1195_v16 }
  0x47   :  { %934 = vmatmul.mubr.msk.f32.vlgmr.msra.gmra.mrb[0].mxu0 %vm91_vm0, %v1339_v33  ;;  %993 = vmatmul.mubr.msk.f32.vlgmr.msra.gmra.mrb[0].mxu1 %vm91_vm0, %v30_v15 }
  0x48   :  { %935 = vmatprep.mubr.msk.f32.mxu0 %vm91_vm0, %v30_v15  ;;  %515 = vmatprep.mubr.f32.mxu1 %v1197_v17 }
  0x4b   :  { %936 = vmatmul.mubr.msk.f32.gmra.mrb[2].mxu0 %vm91_vm0, %v30_v15  ;;  %v610_v15 = vld [vmem:[%s1514_s5] sm:$0x1]  ;;  %s1200_s5 = smov [#allocation3]  }
  0x4c   :  { %999 = vmatprep.mubr.msk.f32.mxu0 %vm1196_vm2, %v1197_v17  ;;  %s822_s9 = sshll.u32 %s1200_s5, 4  ;;  %s823_s9 = int_to_ptr.vmem [resolvable:$true] %s822_s9 }
  0x4d   :  { %s1170_s10 = scalar_lea.vmem %s823_s9, 48  ;;  %s1174_s11 = scalar_lea.vmem %s823_s9, 64 }
  0x4e   :  { %p1171_p0 = scmp.ne.s32.totalorder %s823_s9, %s1170_s10  ;;  %p1175_p1 = scmp.lt.s32.totalorder %s823_s9, %s823_s9 }
  0x4f   :  { %p1176_p2 = scmp.lt.s32.totalorder %s1174_s11, %s1170_s10 }
  0x51   :  { %p1177_p3 = por %p1176_p2, %p1175_p1 }
  0x53   :  { %p1178_p4 = pnand %p1177_p3, %p1171_p0 }
  0x91   :  { %v84_v19 = vpop.permute.xlu0 %83 }
  0x95   :  { %v89_v20 = vpop.permute.xlu0 %88 }
  0x9b   :  { %v435_v61 = vpop.permute.xlu1 %434 }
 0x11a   :  { %v308_v21 = vpop.f32.mrb[0].mxu0  ;;  %v994_v22 = vpop.f32.mrb[0].mxu1 }
 0x11b   :  { %v309_v23 = vadd.f32 %v308_v21, %v84_v19  ;;  %v391_v24 = vadd.f32 %v994_v22, %v89_v20  ;;  %v310_v25 = vpop.f32.mrb[1].mxu0  ;;  %v385_v26 = vpop.f32.mrb[1].mxu1 }
 0x11c   :  { %v311_v27 = vadd.f32 %v310_v25, %v84_v19  ;;  %v386_v28 = vadd.f32 %v385_v26, %v84_v19  ;;  %v618_v19 = vshrl.u32 %v617_v18, 7  ;;  %v615_v21 = vpop.permute.xlu1 %614 }
 0x11d   :  { %v882_v29 = vmul.f32 -1.442695, %v309_v23  ;;  %v887_v30 = vmul.f32 -1.442695, %v391_v24 }
 0x11e   :  { %v883_v31 = vmul.f32 -1.442695, %v311_v27  ;;  %v884_v32 = vmul.f32 -1.442695, %v386_v28  ;;  %v314_v33 = vpop.f32.mrb[2].mxu0 }
 0x11f   :  { %1122 = vpow2.f32 %v882_v29  ;;  %v315_v34 = vadd.f32 %v314_v33, %v89_v20  ;;  %v316_v35 = vpop.f32.mrb[3].mxu0 }
 0x120   :  { %1124 = vpow2.f32 %v887_v30  ;;  %v317_v36 = vadd.f32 %v316_v35, %v89_v20  ;;  %v619_v20 = vsub.s32 0, %v618_v19 }
 0x121   :  { %1126 = vpow2.f32 %v883_v31  ;;  %v885_v37 = vmul.f32 -1.442695, %v315_v34 }
 0x122   :  { %1128 = vpow2.f32 %v884_v32  ;;  %v886_v38 = vmul.f32 -1.442695, %v317_v36  ;;  %v620_v22 = vrot.slane %v615_v21, %v619_v20 }
 0x123   :  { %1130 = vpow2.f32 %v885_v37 }
 0x124   :  { %1132 = vpow2.f32 %v886_v38 }
 0x129   :  { %v1123_v39 = vpop.eup %1122 }
 0x12a   :  { %v1125_v40 = vpop.eup %1124  ;;  %v412_v41 = vadd.f32 1.0, %v1123_v39  ;;  %v1199_v39 = vmov 1966171168  }
 0x12b   :  { %v1127_v42 = vpop.eup %1126  ;;  %v417_v43 = vadd.f32 1.0, %v1125_v40  ;;  %v789_v40 = vunpack.c.l.s4 %v1199_v39 }
 0x12c   :  { %v1129_v44 = vpop.eup %1128  ;;  %1134 = vrcp.f32 %v412_v41  ;;  %v413_v45 = vadd.f32 1.0, %v1127_v42 }
 0x12d   :  { %v1131_v46 = vpop.eup %1130  ;;  %1136 = vrcp.f32 %v417_v43  ;;  %v414_v47 = vadd.f32 1.0, %v1129_v44  ;;  %v790_v41 = vunpack.c.0.s8 %v789_v40 }
 0x12e   :  { %v1133_v48 = vpop.eup %1132  ;;  %1138 = vrcp.f32 %v413_v45  ;;  %v415_v49 = vadd.f32 1.0, %v1131_v46 }
 0x12f   :  { %1140 = vrcp.f32 %v414_v47  ;;  %v416_v50 = vadd.f32 1.0, %v1133_v48  ;;  %v793_v44 = vsub.s32 %v790_v41, %v618_v19 }
 0x130   :  { %1142 = vrcp.f32 %v415_v49 }
 0x131   :  { %1144 = vrcp.f32 %v416_v50 }
 0x136   :  { %v1135_v51 = vpop.eup %1134 }
 0x137   :  { %v1137_v52 = vpop.eup %1136 }
 0x138   :  { %v1139_v53 = vpop.eup %1138 }
 0x139   :  { %v1141_v54 = vpop.eup %1140 }
 0x13a   :  { %v1143_v55 = vpop.eup %1142  ;;  %v1110_v56 = vpack.c.bf16 %v1137_v52, %v1141_v54 }
 0x13b   :  { %v1145_v57 = vpop.eup %1144  ;;  %v1106_v58 = vpack.c.bf16 %v1143_v55, %v1135_v51 }
 0x13c   :  { %1112 = vmatpush3.bf16.msk.msra.mxu0 %vm1104_vm5, %v1110_v56  ;;  %v1103_v60 = vpack.c.bf16 %v1145_v57, %v1139_v53 }
 0x13d   :  { %1002 = vmatprep.subr.mxu0 %v1197_v17 }
 0x13e   :  { %1105 = vmatprep.subr.msk.bf16.mxu1 %vm1104_vm5, %v1103_v60 }
 0x13f   :  { %1000 = vmatmul.mubr.msk.f32.vlgmr.msra.gmra.mrb[4].mxu0 %vm437_vm6, %v430_v59  ;;  %1108 = vmatpush1.bf16.msk.msra.mxu1 %vm1104_vm5, %v1106_v58 }
 0x140   :  { %1004 = vmatprep.mubr.msk.f32.mxu0 %vm1196_vm2, %v1197_v17 }
 0x142   :  { %890 = vmatmul.mubr.msk.f32.vlgmr.msra.gmra.mrb[2].mxu1 %vm437_vm6, %v430_v59 }
 0x143   :  { %689 = vmatprep.mubr.f32.mxu1 %v1197_v17 }
 0x212   :  { %v588_v62 = vpop.f32.mrb[4].mxu0 }
 0x213   :  { %v589_v63 = vadd.f32 %v588_v62, %v435_v61  ;;  %v1001_v0 = vpop.f32.mrb[5].mxu0 }
 0x215   :  { %v895_v1 = vmul.f32 -1.442695, %v589_v63  ;;  %v517_v2 = vpop.f32.mrb[2].mxu1 }
 0x216   :  { %v518_v3 = vadd.f32 %v517_v2, %v435_v61  ;;  %v519_v4 = vpop.f32.mrb[3].mxu1 }
 0x217   :  { %1146 = vpow2.f32 %v895_v1  ;;  %v520_v6 = vadd.f32 %v519_v4, %v435_v61 }
 0x218   :  { %v893_v7 = vmul.f32 -1.442695, %v518_v3 }
 0x219   :  { %v894_v8 = vmul.f32 -1.442695, %v520_v6 }
 0x21a   :  { %1148 = vpow2.f32 %v893_v7 }
 0x21b   :  { %1150 = vpow2.f32 %v894_v8 }
 0x221   :  { %v1147_v9 = vpop.eup %1146 }
 0x222   :  { %v603_v10 = vadd.f32 1.0, %v1147_v9 }
 0x224   :  { %v1149_v11 = vpop.eup %1148  ;;  %1152 = vrcp.f32 %v603_v10 }
 0x225   :  { %v1151_v12 = vpop.eup %1150  ;;  %v601_v13 = vadd.f32 1.0, %v1149_v11 }
 0x226   :  { %v602_v14 = vadd.f32 1.0, %v1151_v12 }
 0x228   :  { %1154 = vrcp.f32 %v602_v14 }
 0x229   :  { %1156 = vrcp.f32 %v601_v13 }
 0x22e   :  { %v1153_v16 = vpop.eup %1152 }
 0x22f   :  { %1003 = vmatpush3.msra.mxu0 %v1153_v16 }
 0x230   :  { %1005 = vmatmul.mubr.msk.f32.vlgmr.msra.gmra.mrb[6].mxu0 %vm621_vm7, %v610_v15 }
 0x232   :  { %v1155_v17 = vpop.eup %1154 }
 0x233   :  { %v1157_v5 = vpop.eup %1156  ;;  %625 = vmatprep.subr.mxu1 %v1155_v17 }
 0x234   :  { %626 = vmatpush1.msra.mxu1 %v1157_v5 }
 0x235   :  { %896 = vmatmul.mubr.msk.f32.vlgmr.msra.gmra.mrb[4].mxu1 %vm621_vm7, %v610_v15 }
 0x303   :  { %v762_v23 = vpop.f32.mrb[6].mxu0 }
 0x304   :  { %v763_v24 = vadd.f32 %v762_v23, %v620_v22  ;;  %v1006_v25 = vpop.f32.mrb[7].mxu0 }
 0x306   :  { %v900_v26 = vmul.f32 -1.442695, %v763_v24 }
 0x308   :  { %1158 = vpow2.f32 %v900_v26  ;;  %v691_v27 = vpop.f32.mrb[4].mxu1 }
 0x309   :  { %v692_v28 = vadd.f32 %v691_v27, %v620_v22  ;;  %v693_v29 = vpop.f32.mrb[5].mxu1 }
 0x30a   :  { %v694_v30 = vadd.f32 %v693_v29, %v620_v22 }
 0x30b   :  { %v898_v31 = vmul.f32 -1.442695, %v692_v28 }
 0x30c   :  { %v899_v32 = vmul.f32 -1.442695, %v694_v30 }
 0x30d   :  { %1160 = vpow2.f32 %v898_v31 }
 0x30e   :  { %1162 = vpow2.f32 %v899_v32 }
 0x312   :  { %v1159_v33 = vpop.eup %1158 }
 0x313   :  { %v777_v34 = vadd.f32 1.0, %v1159_v33 }
 0x315   :  { %1164 = vrcp.f32 %v777_v34 }
 0x317   :  { %v1161_v35 = vpop.eup %1160 }
 0x318   :  { %v1163_v36 = vpop.eup %1162  ;;  %v775_v37 = vadd.f32 1.0, %v1161_v35 }
 0x319   :  { %v776_v38 = vadd.f32 1.0, %v1163_v36 }
 0x31a   :  { %1166 = vrcp.f32 %v775_v37 }
 0x31b   :  { %1168 = vrcp.f32 %v776_v38 }
 0x31f   :  { %v1165_v42 = vpop.eup %1164 }
 0x320   :  { %v801_v48 = vrot.slane %v1165_v42, %v793_v44 }
 0x324   :  { %v1167_v43 = vpop.eup %1166 }
 0x325   :  { %v1169_v45 = vpop.eup %1168 }
 0x326   :  { %v787_v46 = vcombine.low %v1167_v43, %v1169_v45 }
 0x328   :  { %v794_v47 = vrot.slane %v787_v46, %v793_v44 }
 0x32a   :  { %v802_v49 = vcombine.low %v794_v47, %v801_v48 }
 0x32c   :  { %v809_v50 = vrot.slane %v802_v49, %v793_v44 }
 0x32e   :  { %815 = vst.msk [vmem:[#allocation3] sm:$0x7] %vm813_vm8, %v809_v50 }
 0x32f   :  { %1181 = shalt.err (!%p1178_p4)
}
 0x330   :  { %s1182_s14 = scalar_lea.hbm %s1516_s7, 48 }
 0x331   :  { %p1183_p5 = scmp.ne.s32.totalorder %s1516_s7, %s1182_s14  ;;  %p1186_p6 = scmp.lt.u32.totalorder %s1182_s14, %s1516_s7 }
 0x333   :  { %p1188_p7 = pnand %p1186_p6, %p1183_p5 }
 0x335   :  { %1191 = shalt.err (!%p1188_p7)
}
 0x336   :  { %825 = dma.vmem_to_hbm [thread:$0]  %s823_s9, 48, %s1516_s7, [#allocation4]  }
 0x337   :  { %1192 = dma.done.wait [#allocation4], 48  }
 0x338   :  { %1193 = vsyncadd [#allocation4], 4294967248 }
 0x339   :  { %829 = vsyncpa [#allocation4], 1 }

</bundles_post_ra>
